<compile_context>
chip_gen: v6e
topology: v6e:2x2x1
jax: 0.10.0
libtpu: 0.0.40
codegen_flags: <defaults>
</compile_context>

<pallas_src>
import jax
import jax.numpy as jnp
from jax.experimental import pallas as pl
from jax.experimental.pallas import tpu as pltpu


def _round_up(v, m):
    return ((v + m - 1) // m) * m


def _pick_tile(dim, default, align):
    """Largest legal tile <= default.

    Either the full extent (always legal, no masking needed) or an
    `align`-aligned default (ragged last tile handled by Pallas masking).
    """
    default = max(align, (default // align) * align)
    return dim if dim <= default else default


def bias_layer_kernel(coef_ref, x_ref, o_ref):
    """o = coef[0] * x + coef[1], broadcast over rows.

    coef_ref : VMEM (2, TN)  — row 0 = per-column multiplier, row 1 = bias
    x_ref    : VMEM (TB, TN)
    o_ref    : VMEM (TB, TN)
    Pure VPU FMA; HBM-bandwidth-bound.
    """
    o_ref[...] = coef_ref[0:1, :] * x_ref[...] + coef_ref[1:2, :]


def bias_layer_forward(x, alpha, beta, clss_mask, *, tb=512, tn=1024):
    """BiasLayer forward.

    x         : (B, N) logits
    alpha     : (1,) scalar parameter (init 1.0)
    beta      : (1,) scalar parameter (init 0.0)
    clss_mask : (N,) bool/0-1 mask, True where the column index is in `clss`
    """
    B, N = x.shape
    dtype = x.dtype
    sub = 16 if dtype == jnp.bfloat16 else 8      # sublane alignment per dtype

    tb = _pick_tile(B, tb, sub)
    tn = _pick_tile(N, tn, 128)

    # v7x megacore: if the row axis yields a single grid step (small B, the
    # usual case for logits), split columns so >=2 parallel steps exist.
    if pl.cdiv(B, tb) < 2 and N >= 256:
        while tn > 128 and pl.cdiv(N, tn) < 2:
            tn = max(128, _round_up(tn // 2, 128))

    n_col_blocks = pl.cdiv(N, tn)
    n_row_blocks = pl.cdiv(B, tb)

    # Fold scalar params + class mask into one tiny (2, n_col_blocks*tn)
    # coefficient array (in XLA, once):
    #   clss columns     -> alpha * x + beta
    #   non-clss columns -> 1 * x + 1   (mirrors PyTorch's ones_like init)
    # Only this O(N)-byte array is padded; x / out are never padded or sliced.
    n_pad = n_col_blocks * tn
    mask_p = jnp.pad(clss_mask.astype(bool), (0, n_pad - N), constant_values=False)
    one = jnp.asarray(1.0, dtype)
    a_row = jnp.where(mask_p, alpha[0].astype(dtype), one)
    b_row = jnp.where(mask_p, beta[0].astype(dtype), one)
    coef = jnp.stack([a_row, b_row], axis=0)                  # (2, n_pad)

    # Column blocks outermost: the coef block index (0, j) is constant across
    # the inner row sweep, so Pallas keeps its buffer resident (no per-step
    # re-DMA of the coefficients).
    grid = (n_col_blocks, n_row_blocks)

    # TODO(synk): in a real BiC model, fuse this FMA into the epilogue of the
    # matmul that produces the logits (and/or alias x's HBM buffer via
    # input_output_aliases when x is dead) instead of a standalone pass.
    return pl.pallas_call(
        bias_layer_kernel,
        out_shape=jax.ShapeDtypeStruct((B, N), dtype),
        grid=grid,
        in_specs=[
            pl.BlockSpec((2, tn), lambda j, i: (0, j)),       # coef (resident per column block)
            pl.BlockSpec((tb, tn), lambda j, i: (i, j)),      # x tile
        ],
        out_specs=pl.BlockSpec((tb, tn), lambda j, i: (i, j)),
        compiler_params=pltpu.CompilerParams(
            dimension_semantics=("parallel", "parallel"),     # megacore sharding on v7x
        ),
    )(coef, x)


if __name__ == "__main__":
    key1, key2 = jax.random.split(jax.random.PRNGKey(0))

    def reference(x, alpha, beta, clss_idx):
        # Pure-JAX mirror of the PyTorch forward.
        a_full = jnp.ones_like(x).at[:, clss_idx].set(alpha[0])
        b_full = jnp.ones_like(x).at[:, clss_idx].set(beta[0])
        return a_full * x + b_full

    # Deterministic parameter init, same as the module's __init__.
    alpha = jnp.ones((1,), jnp.float32)    # torch.nn.Parameter(torch.ones(1))
    beta = jnp.zeros((1,), jnp.float32)    # torch.nn.Parameter(torch.zeros(1))

    # Case 1: the module's typical use — a small batch of logits.
    B, N = 2, 32
    clss = jnp.array([3, 5, 10, 11, 17, 30], dtype=jnp.int32)
    x = jax.random.normal(key1, (B, N), dtype=jnp.float32)
    mask = jnp.zeros((N,), jnp.bool_).at[clss].set(True)
    out = jax.block_until_ready(bias_layer_forward(x, alpha, beta, mask))
    ref = reference(x, alpha, beta, clss)
    assert out.shape == ref.shape, "shape mismatch vs reference (case 1)"
    assert jnp.allclose(out, ref, atol=1e-6), "mismatch vs reference (case 1)"

    # Case 2: small but ragged-vs-tile shapes (tiles forced small) to exercise
    # the cdiv grid and masked last-tile writes.
    B2, N2 = 20, 300
    clss2 = jnp.array([0, 7, 130, 131, 299], dtype=jnp.int32)
    x2 = jax.random.normal(key2, (B2, N2), dtype=jnp.float32)
    mask2 = jnp.zeros((N2,), jnp.bool_).at[clss2].set(True)
    out2 = jax.block_until_ready(
        bias_layer_forward(x2, alpha, beta, mask2, tb=8, tn=128))
    ref2 = reference(x2, alpha, beta, clss2)
    assert out2.shape == ref2.shape, "shape mismatch vs reference (case 2)"
    assert jnp.allclose(out2, ref2, atol=1e-6), "mismatch vs reference (case 2)"

    print("KERNEL_OK")
</pallas_src>

<mosaic_0001>
module attributes {stable_mosaic.version = 11 : i64} {
  func.func @bias_layer_kernel(%arg0: i32, %arg1: i32, %arg2: memref<2x32xf32, #tpu.memory_space<vmem>>, %arg3: memref<2x32xf32, #tpu.memory_space<vmem>>, %arg4: memref<2x32xf32, #tpu.memory_space<vmem>>) attributes {dimension_semantics = [#tpu.dimension_semantics<parallel>, #tpu.dimension_semantics<parallel>], iteration_bounds = array<i64: 1, 1>, scalar_prefetch = 0 : i64, scratch_operands = 0 : i64, tpu.core_type = #tpu.core_type<tc>, window_params = [{transform_indices = @transform_0, window_bounds = array<i64: 2, 32>}, {transform_indices = @transform_1, window_bounds = array<i64: 2, 32>}, {transform_indices = @transform_2, window_bounds = array<i64: 2, 32>}]} {
    %c0 = arith.constant 0 : index
    %c0_0 = arith.constant 0 : index
    %0 = vector.load %arg2[%c0, %c0_0] : memref<2x32xf32, #tpu.memory_space<vmem>>, vector<1x32xf32>
    %c0_1 = arith.constant 0 : index
    %c0_2 = arith.constant 0 : index
    %1 = vector.load %arg3[%c0_1, %c0_2] : memref<2x32xf32, #tpu.memory_space<vmem>>, vector<2x32xf32>
    %2 = vector.broadcast %0 : vector<1x32xf32> to vector<2x32xf32>
    %3 = arith.mulf %2, %1 : vector<2x32xf32>
    %c1 = arith.constant 1 : index
    %c0_3 = arith.constant 0 : index
    %4 = vector.load %arg2[%c1, %c0_3] : memref<2x32xf32, #tpu.memory_space<vmem>>, vector<1x32xf32>
    %5 = vector.broadcast %4 : vector<1x32xf32> to vector<2x32xf32>
    %6 = arith.addf %3, %5 : vector<2x32xf32>
    %c0_4 = arith.constant 0 : index
    %c0_5 = arith.constant 0 : index
    %7 = vector.load %arg4[%c0_4, %c0_5] : memref<2x32xf32, #tpu.memory_space<vmem>>, vector<2x32xf32>
    tpu.vector_store %arg4[%c0_4, %c0_5], %6 {strides = array<i32>} : memref<2x32xf32, #tpu.memory_space<vmem>>, vector<2x32xf32>,
    return
  }
  func.func @transform_0(%arg0: i32, %arg1: i32) -> (i32, i32) {
    %c0_i32 = arith.constant 0 : i32
    %c0_i32_0 = arith.constant 0 : i32
    return %c0_i32, %arg0 : i32, i32
  }
  func.func @transform_1(%arg0: i32, %arg1: i32) -> (i32, i32) {
    %c0_i32 = arith.constant 0 : i32
    return %arg1, %arg0 : i32, i32
  }
  func.func @transform_2(%arg0: i32, %arg1: i32) -> (i32, i32) {
    %c0_i32 = arith.constant 0 : i32
    return %arg1, %arg0 : i32, i32
  }
}

</mosaic_0001>

<bundles_post_ra>
// kernel: tpu_custom_call.1
= control target key start
LH: loop header
LB: loop body
LE: loop exit
PB: predicated region body
PF: predicated region fallthrough
CT: control target
= control target key end

     0   :  { %7 = vsyncpa [#allocation3], 0  ;;  %s165_s0 = inlined_call_operand.hbm [shape: f32[2,32], index: 0, kind: input, shape index: {}]   ;;  %s166_s1 = inlined_call_operand.hbm [shape: f32[2,32], index: 1, kind: input, shape index: {}]   ;;  %s167_s2 = inlined_call_operand.hbm [shape: f32[2,32], index: 2, kind: output, shape index: {}]  }
   0x1   :  { %8 = vsyncpa [#allocation6], 0 }
   0x2   :  { %9 = vsyncpa [#allocation4], 0  ;;  %s138_s9 = smov [#allocation2]   ;;  %s139_s11 = smov [#allocation5]  }
   0x3   :  { %s16_s10 = sshll.u32 %s138_s9, 4  ;;  %s26_s12 = sshll.u32 %s139_s11, 4  ;;  %s17_s10 = int_to_ptr.vmem [resolvable:$true] %s16_s10  ;;  %s27_s12 = int_to_ptr.vmem [resolvable:$true] %s26_s12 }
   0x4   :  { %s80_s13 = scalar_lea.vmem %s17_s10, 32  ;;  %p85_p1 = scmp.lt.s32.totalorder %s17_s10, %s17_s10 }
   0x5   :  { %p81_p0 = scmp.ne.s32.totalorder %s17_s10, %s80_s13  ;;  %p86_p2 = scmp.lt.s32.totalorder %s80_s13, %s80_s13 }
   0x7   :  { %p87_p3 = por %p86_p2, %p85_p1 }
   0x9   :  { %p88_p4 = pnand %p87_p3, %p81_p0 }
   0xb   :  { %91 = shalt.err (!%p88_p4)
}
   0xc   :  { %19 = dma.hbm_to_vmem [thread:$0]  %s165_s0, 32, %s17_s10, [#allocation3]  }
   0xd   :  { %s100_s16 = scalar_lea.vmem %s27_s12, 32  ;;  %p105_p6 = scmp.lt.s32.totalorder %s27_s12, %s27_s12 }
   0xe   :  { %p101_p5 = scmp.ne.s32.totalorder %s27_s12, %s100_s16  ;;  %p106_p7 = scmp.lt.s32.totalorder %s100_s16, %s100_s16 }
  0x10   :  { %p107_p8 = por %p106_p7, %p105_p6 }
  0x12   :  { %p108_p9 = pnand %p107_p8, %p101_p5 }
  0x14   :  { %111 = shalt.err (!%p108_p9)
}
  0x15   :  { %29 = dma.hbm_to_vmem [thread:$0]  %s166_s1, 32, %s27_s12, [#allocation6]  }
  0x16   :  { %132 = dma.done.wait [#allocation3], 32  }
  0x17   :  { %133 = vsyncadd [#allocation3], 4294967264 }
  0x18   :  { %134 = dma.done.wait [#allocation6], 32  }
  0x19   :  { %135 = vsyncadd [#allocation6], 4294967264  ;;  %s140_s19 = smov [#allocation7]   ;;  %v67_v0 = vld [vmem:[#allocation2] ss:$0 sm:$0xff]  ;;  %vm49_vm0 = vcmask 254976  }
  0x1a   :  { %s57_s20 = sshll.u32 %s140_s19, 4  ;;  %v37_v1 = vld [vmem:[#allocation5] sm:$0x3]  ;;  %v68_v2 = vld [vmem:[#allocation2 + $0x1] ss:$0 sm:$0xff]  ;;  %s58_s20 = int_to_ptr.vmem [resolvable:$true] %s57_s20 }
  0x1b   :  { %v42_v3 = vmul.f32 %v67_v0, %v37_v1  ;;  %s112_s0 = scalar_lea.vmem %s58_s20, 32  ;;  %p117_p11 = scmp.lt.s32.totalorder %s58_s20, %s58_s20 }
  0x1c   :  { %p113_p10 = scmp.ne.s32.totalorder %s58_s20, %s112_s0  ;;  %p118_p12 = scmp.lt.s32.totalorder %s112_s0, %s112_s0 }
  0x1d   :  { %v48_v4 = vadd.f32 %v68_v2, %v42_v3 }
  0x1e   :  { %p119_p13 = por %p118_p12, %p117_p11 }
  0x1f   :  { %50 = vst.msk [vmem:[#allocation7] sm:$0x3] %vm49_vm0, %v48_v4 }
  0x20   :  { %p120_p0 = pnand %p119_p13, %p113_p10 }
  0x22   :  { %123 = shalt.err (!%p120_p0)
}
  0x23   :  { %60 = dma.vmem_to_hbm [thread:$0]  %s58_s20, 32, %s167_s2, [#allocation4]  }
  0x24   :  { %136 = dma.done.wait [#allocation4], 32  }
  0x25   :  { %137 = vsyncadd [#allocation4], 4294967264 }
  0x26   :  { %64 = vsyncpa [#allocation3], 1 }
  0x27   :  { %65 = vsyncpa [#allocation6], 1 }
  0x28   :  { %66 = vsyncpa [#allocation4], 1 }

</bundles_post_ra>
